<compile_context>
chip_gen: v7x
topology: tpu7x:2x2x1
jax: 0.10.0
libtpu: 0.0.40
codegen_flags: <defaults>
</compile_context>

<pallas_src>
import jax
import jax.numpy as jnp
from jax.experimental import pallas as pl
from jax.experimental.pallas import tpu as pltpu

_N_PAD = 128  # lane-dense padded width of the 2-wide beta_head output


def _round_up(x, m):
    return ((x + m - 1) // m) * m


def beta_head_kernel(x_ref, w1_ref, b1_ref, w2_ref, b2_ref, out_ref):
    """beta_head MLP + softplus for one batch tile, entirely in VMEM.

    x_ref  : (TB, H)    last-token hidden states (native dtype; cast in-kernel)
    w1_ref : (H, D)     bf16 first Linear weight (pre-transposed, grid-invariant)
    b1_ref : (1, D)     f32  first Linear bias
    w2_ref : (D, 128)   bf16 second Linear weight, zero-padded N: 2 -> 128
    b2_ref : (1, 128)   f32  second Linear bias, zero-padded
    out_ref: (TB, 128)  f32  softplus output; columns 0/1 are alpha/beta
    """
    x = x_ref[...].astype(jnp.bfloat16)          # VPU cast, hidden under weight DMA
    # (TB, H) @ (H, D) on the MXU, f32 accumulate.
    h = jnp.dot(x, w1_ref[...], preferred_element_type=jnp.float32)
    h = jnp.maximum(h + b1_ref[...], 0.0)        # bias + ReLU (f32, VPU)
    # (TB, D) @ (D, 128): lane-dense padded N instead of an N=2 sliver.
    z = jnp.dot(h.astype(jnp.bfloat16), w2_ref[...],
                preferred_element_type=jnp.float32)
    z = z + b2_ref[...]
    # numerically stable softplus; exp/log1p run on the (otherwise idle) EUP.
    sp = jnp.maximum(z, 0.0) + jnp.log1p(jnp.exp(-jnp.abs(z)))
    out_ref[...] = sp + 1e-8


def prepare_beta_head_params(w1, b1, w2, b2):
    """One-time parameter prep (hoisted out of the per-forward hot path)."""
    H, D = w1.shape
    w2p = jnp.zeros((D, _N_PAD), jnp.bfloat16).at[:, :2].set(w2.astype(jnp.bfloat16))
    b2p = jnp.zeros((1, _N_PAD), jnp.float32).at[:, :2].set(
        b2.reshape(1, -1).astype(jnp.float32))
    return {
        "w1": w1.astype(jnp.bfloat16),                     # (H, D) bf16
        "b1": b1.reshape(1, -1).astype(jnp.float32),       # (1, D) f32
        "w2p": w2p,                                        # (D, 128) bf16
        "b2p": b2p,                                        # (1, 128) f32
    }


def beta_head(last_token_hidden, head_params, *, block_b=256):
    """Calls the Pallas kernel; returns (alpha, beta), each of shape (B,)."""
    B, H = last_token_hidden.shape
    w1, b1 = head_params["w1"], head_params["b1"]
    w2p, b2p = head_params["w2p"], head_params["b2p"]
    D = w1.shape[1]

    # Batch tile: multiple of 16 (bf16 sublane packing — never 8), at most
    # block_b (256 fills the v6e/v7x MXU M dim), and split into >=2 tiles when
    # possible so the "parallel" axis can shard across v7x's two TensorCores.
    b16 = _round_up(B, 16)
    tb = min(block_b, b16)
    if b16 >= 32:
        tb = min(tb, _round_up(pl.cdiv(b16, 2), 16))
    b_pad = _round_up(B, tb)

    x = last_token_hidden
    if b_pad != B:
        x = jnp.pad(x, ((0, b_pad - B), (0, 0)))
    x_bytes = x.dtype.itemsize

    grid = (b_pad // tb,)

    # Actual VMEM footprint: x/out blocks double-buffered, grid-invariant
    # weights single-buffered (Buffered(1)); margin for Mosaic internal
    # scratch.  Hard cap 48 MiB — never request v7x's whole 64 MiB.
    vmem_bytes = (2 * (tb * H * x_bytes + tb * _N_PAD * 4)
                  + H * D * 2 + 8 * D * 4 + D * _N_PAD * 2 + 8 * _N_PAD * 4)
    vmem_limit = int(min(max(vmem_bytes + (8 << 20), 16 << 20), 48 << 20))

    cost = pl.CostEstimate(
        flops=2 * b_pad * (H * D + D * _N_PAD),
        transcendentals=2 * b_pad * _N_PAD,
        bytes_accessed=int(x.size * x_bytes + w1.size * 2 + b1.size * 4
                           + w2p.size * 2 + b2p.size * 4 + b_pad * _N_PAD * 4),
    )

    single = pl.Buffered(1)  # weights never change across grid steps
    out = pl.pallas_call(
        beta_head_kernel,
        out_shape=jax.ShapeDtypeStruct((b_pad, _N_PAD), jnp.float32),
        grid=grid,
        in_specs=[
            pl.BlockSpec((tb, H), lambda i: (i, 0)),                          # x
            pl.BlockSpec((H, D), lambda i: (0, 0), pipeline_mode=single),     # w1
            pl.BlockSpec((1, D), lambda i: (0, 0), pipeline_mode=single),     # b1
            pl.BlockSpec((D, _N_PAD), lambda i: (0, 0), pipeline_mode=single),  # w2
            pl.BlockSpec((1, _N_PAD), lambda i: (0, 0), pipeline_mode=single),  # b2
        ],
        out_specs=pl.BlockSpec((tb, _N_PAD), lambda i: (i, 0)),
        compiler_params=pltpu.CompilerParams(
            dimension_semantics=("parallel",),
            vmem_limit_bytes=vmem_limit),
        cost_estimate=cost,
    )(x, w1, b1, w2p, b2p)

    alpha = out[:B, 0]
    beta = out[:B, 1]
    return alpha, beta


def synthetic_base_model_hidden(input_ids, attention_mask, position_ids,
                                tok_embed, pos_embed):
    # TODO(synk): the pretrained AutoModelForCausalLM base model has no clean Pallas
    # equivalent (external checkpoint); replaced by a deterministic embedding stand-in
    # that produces the last-layer hidden_states tensor (B, S, H).
    h = tok_embed[input_ids] + pos_embed[position_ids]          # (B, S, H)
    h = h * attention_mask[..., None].astype(h.dtype)
    return jnp.tanh(h)


def beta_policy_forward(input_ids, attention_mask, position_ids, params):
    hidden_states = synthetic_base_model_hidden(
        input_ids, attention_mask, position_ids,
        params["tok_embed"], params["pos_embed"])
    # Literal last-position token, exactly as the torch module does.
    last_token_hidden = hidden_states[:, -1, :]                  # (B, H)
    # TODO(synk): cross-pallas_call prefetch (P10) of w1 behind the base-model
    # forward (to hide the dominant weight HBM load at realistic sizes) is not
    # implemented here; weights are fetched by the beta_head call itself.
    return beta_head(last_token_hidden, params["head"])


if __name__ == "__main__":
    # Small shapes consistent with the module: batch=2, seq=8, hidden=32,
    # beta_hidden_dim=128 (stand-in for 2048), vocab=64.
    B, S, H, D, V = 2, 8, 32, 128, 64

    key = jax.random.PRNGKey(0)
    k1, k2, k3, k4, k5, k6, k7 = jax.random.split(key, 7)

    input_ids = jax.random.randint(k1, (B, S), 0, V, dtype=jnp.int32)
    attention_mask = jnp.ones((B, S), dtype=jnp.int32)
    position_ids = jnp.tile(jnp.arange(S, dtype=jnp.int32)[None, :], (B, 1))

    # Raw (torch-layout-transposed) parameters.
    tok_embed = 0.02 * jax.random.normal(k2, (V, H), jnp.float32)
    pos_embed = 0.02 * jax.random.normal(k3, (S, H), jnp.float32)
    w1 = jax.random.normal(k4, (H, D), jnp.float32) / jnp.sqrt(H)   # nn.Linear(H, D).T
    b1 = 0.01 * jax.random.normal(k5, (1, D), jnp.float32)
    w2 = jax.random.normal(k6, (D, 2), jnp.float32) / jnp.sqrt(D)   # nn.Linear(D, 2).T
    b2 = 0.01 * jax.random.normal(k7, (1, 2), jnp.float32)

    params = {
        "tok_embed": tok_embed,
        "pos_embed": pos_embed,
        # One-time prep: padding / casts hoisted out of the per-forward path.
        "head": prepare_beta_head_params(w1, b1, w2, b2),
    }

    alpha, beta = beta_policy_forward(input_ids, attention_mask, position_ids, params)
    jax.block_until_ready((alpha, beta))

    # Pure-JAX reference (f32) with bf16-appropriate tolerance.
    h_ref = synthetic_base_model_hidden(input_ids, attention_mask, position_ids,
                                        tok_embed, pos_embed)
    lt = h_ref[:, -1, :]
    z1 = jnp.maximum(lt @ w1 + b1, 0.0)
    z2 = z1 @ w2 + b2
    sp = jnp.maximum(z2, 0.0) + jnp.log1p(jnp.exp(-jnp.abs(z2))) + 1e-8
    assert jnp.allclose(alpha, sp[:, 0], rtol=2e-2, atol=2e-3)
    assert jnp.allclose(beta, sp[:, 1], rtol=2e-2, atol=2e-3)

    assert alpha.shape == (B,) and beta.shape == (B,)
    assert bool(jnp.all(alpha > 0)) and bool(jnp.all(beta > 0))
    print("KERNEL_OK")
</pallas_src>

<mosaic_0001>
module attributes {stable_mosaic.version = 11 : i64} {
  func.func @beta_head_kernel(%arg0: i32, %arg1: memref<16x32xf32, #tpu.memory_space<vmem>>, %arg2: memref<32x128xbf16, #tpu.memory_space<vmem>>, %arg3: memref<1x128xf32, #tpu.memory_space<vmem>>, %arg4: memref<128x128xbf16, #tpu.memory_space<vmem>>, %arg5: memref<1x128xf32, #tpu.memory_space<vmem>>, %arg6: memref<16x128xf32, #tpu.memory_space<vmem>>) attributes {dimension_semantics = [#tpu.dimension_semantics<parallel>], iteration_bounds = array<i64: 1>, scalar_prefetch = 0 : i64, scratch_operands = 0 : i64, tpu.core_type = #tpu.core_type<tc>, window_params = [{transform_indices = @transform_0, window_bounds = array<i64: 16, 32>}, {pipeline_mode = #tpu.pipeline_mode<synchronous>, transform_indices = @transform_1, window_bounds = array<i64: 32, 128>}, {pipeline_mode = #tpu.pipeline_mode<synchronous>, transform_indices = @transform_2, window_bounds = array<i64: 1, 128>}, {pipeline_mode = #tpu.pipeline_mode<synchronous>, transform_indices = @transform_3, window_bounds = array<i64: 128, 128>}, {pipeline_mode = #tpu.pipeline_mode<synchronous>, transform_indices = @transform_4, window_bounds = array<i64: 1, 128>}, {transform_indices = @transform_5, window_bounds = array<i64: 16, 128>}]} {
    %c0 = arith.constant 0 : index
    %c0_0 = arith.constant 0 : index
    %0 = vector.load %arg1[%c0, %c0_0] : memref<16x32xf32, #tpu.memory_space<vmem>>, vector<16x32xf32>
    %1 = arith.truncf %0 : vector<16x32xf32> to vector<16x32xbf16>
    %c0_1 = arith.constant 0 : index
    %c0_2 = arith.constant 0 : index
    %2 = vector.load %arg2[%c0_1, %c0_2] : memref<32x128xbf16, #tpu.memory_space<vmem>>, vector<32x128xbf16>
    %cst = arith.constant dense<0.000000e+00> : vector<16x128xf32>
    %3 = tpu.matmul %1, %2, %cst {dimension_numbers = #tpu.dot_dimension_numbers<[1], [0], [0], [1], [0, 0, 1, 1], [], []>} : vector<16x32xbf16>, vector<32x128xbf16>, vector<16x128xf32> -> vector<16x128xf32>
    %c0_3 = arith.constant 0 : index
    %c0_4 = arith.constant 0 : index
    %4 = vector.load %arg3[%c0_3, %c0_4] : memref<1x128xf32, #tpu.memory_space<vmem>>, vector<1x128xf32>
    %5 = vector.broadcast %4 : vector<1x128xf32> to vector<16x128xf32>
    %6 = arith.addf %3, %5 : vector<16x128xf32>
    %cst_5 = arith.constant 0.000000e+00 : f32
    %7 = vector.broadcast %cst_5 : f32 to vector<16x128xf32>
    %8 = arith.maximumf %6, %7 : vector<16x128xf32>
    %9 = arith.truncf %8 : vector<16x128xf32> to vector<16x128xbf16>
    %c0_6 = arith.constant 0 : index
    %c0_7 = arith.constant 0 : index
    %10 = vector.load %arg4[%c0_6, %c0_7] : memref<128x128xbf16, #tpu.memory_space<vmem>>, vector<128x128xbf16>
    %cst_8 = arith.constant dense<0.000000e+00> : vector<16x128xf32>
    %11 = tpu.matmul %9, %10, %cst_8 {dimension_numbers = #tpu.dot_dimension_numbers<[1], [0], [0], [1], [0, 0, 1, 1], [], []>} : vector<16x128xbf16>, vector<128x128xbf16>, vector<16x128xf32> -> vector<16x128xf32>
    %c0_9 = arith.constant 0 : index
    %c0_10 = arith.constant 0 : index
    %12 = vector.load %arg5[%c0_9, %c0_10] : memref<1x128xf32, #tpu.memory_space<vmem>>, vector<1x128xf32>
    %13 = vector.broadcast %12 : vector<1x128xf32> to vector<16x128xf32>
    %14 = arith.addf %11, %13 : vector<16x128xf32>
    %cst_11 = arith.constant 0.000000e+00 : f32
    %15 = vector.broadcast %cst_11 : f32 to vector<16x128xf32>
    %16 = arith.maximumf %14, %15 : vector<16x128xf32>
    %17 = math.absf %14 : vector<16x128xf32>
    %cst_12 = arith.constant 0.000000e+00 : f32
    %18 = vector.broadcast %cst_12 : f32 to vector<16x128xf32>
    %19 = arith.subf %18, %17 : vector<16x128xf32>
    %20 = math.exp %19 : vector<16x128xf32>
    %21 = math.log1p %20 : vector<16x128xf32>
    %22 = arith.addf %16, %21 : vector<16x128xf32>
    %cst_13 = arith.constant 9.99999993E-9 : f32
    %23 = vector.broadcast %cst_13 : f32 to vector<16x128xf32>
    %24 = arith.addf %22, %23 : vector<16x128xf32>
    %c0_14 = arith.constant 0 : index
    %c0_15 = arith.constant 0 : index
    %25 = vector.load %arg6[%c0_14, %c0_15] : memref<16x128xf32, #tpu.memory_space<vmem>>, vector<16x128xf32>
    tpu.vector_store %arg6[%c0_14, %c0_15], %24 {strides = array<i32>} : memref<16x128xf32, #tpu.memory_space<vmem>>, vector<16x128xf32>,
    return
  }
  func.func @transform_0(%arg0: i32) -> (i32, i32) {
    %c0_i32 = arith.constant 0 : i32
    %c0_i32_0 = arith.constant 0 : i32
    return %arg0, %c0_i32 : i32, i32
  }
  func.func @transform_1(%arg0: i32) -> (i32, i32) {
    %c0_i32 = arith.constant 0 : i32
    %c0_i32_0 = arith.constant 0 : i32
    %c0_i32_1 = arith.constant 0 : i32
    return %c0_i32, %c0_i32_0 : i32, i32
  }
  func.func @transform_2(%arg0: i32) -> (i32, i32) {
    %c0_i32 = arith.constant 0 : i32
    %c0_i32_0 = arith.constant 0 : i32
    %c0_i32_1 = arith.constant 0 : i32
    return %c0_i32, %c0_i32_0 : i32, i32
  }
  func.func @transform_3(%arg0: i32) -> (i32, i32) {
    %c0_i32 = arith.constant 0 : i32
    %c0_i32_0 = arith.constant 0 : i32
    %c0_i32_1 = arith.constant 0 : i32
    return %c0_i32, %c0_i32_0 : i32, i32
  }
  func.func @transform_4(%arg0: i32) -> (i32, i32) {
    %c0_i32 = arith.constant 0 : i32
    %c0_i32_0 = arith.constant 0 : i32
    %c0_i32_1 = arith.constant 0 : i32
    return %c0_i32, %c0_i32_0 : i32, i32
  }
  func.func @transform_5(%arg0: i32) -> (i32, i32) {
    %c0_i32 = arith.constant 0 : i32
    %c0_i32_0 = arith.constant 0 : i32
    return %arg0, %c0_i32 : i32, i32
  }
}

</mosaic_0001>

<bundles_post_ra>
// kernel: tpu_custom_call.1
= control target key start
LH: loop header
LB: loop body
LE: loop exit
PB: predicated region body
PF: predicated region fallthrough
CT: control target
= control target key end

     0   :  { %10 = vsyncpa [#allocation3], 0  ;;  %s582_s0 = inlined_call_operand.hbm [shape: f32[16,32], index: 0, kind: input, shape index: {}]   ;;  %s583_s1 = inlined_call_operand.hbm [shape: bf16[32,128], index: 1, kind: input, shape index: {}]   ;;  %s584_s2 = inlined_call_operand.vmem [shape: f32[1,128], index: 2, kind: input, shape index: {}]   ;;  %s585_s3 = inlined_call_operand.hbm [shape: bf16[128,128], index: 3, kind: input, shape index: {}]   ;;  %s586_s4 = inlined_call_operand.vmem [shape: f32[1,128], index: 4, kind: input, shape index: {}]   ;;  %s587_s5 = inlined_call_operand.hbm [shape: f32[16,128], index: 5, kind: output, shape index: {}]  }
   0x1   :  { %11 = vsyncpa [#allocation6], 0 }
   0x2   :  { %12 = vsyncpa [#allocation4], 0  ;;  %s476_s18 = smov [#allocation5]   ;;  %s382_s22 = scalar_lea.hbm %s583_s1, 256 }
   0x3   :  { %s30_s19 = sshll.u32 %s476_s18, 4  ;;  %p383_p0 = scmp.ne.s32.totalorder %s583_s1, %s382_s22  ;;  %s31_s19 = int_to_ptr.vmem [resolvable:$true] %s30_s19 }
   0x4   :  { %p386_p1 = scmp.lt.u32.totalorder %s382_s22, %s583_s1 }
   0x6   :  { %p388_p2 = pnand %p386_p1, %p383_p0 }
   0x8   :  { %391 = shalt.err (!%p388_p2)
}
   0x9   :  { %s392_s27 = scalar_lea.vmem %s31_s19, 256  ;;  %p397_p4 = scmp.lt.s32.totalorder %s31_s19, %s31_s19 }
   0xa   :  { %p393_p3 = scmp.ne.s32.totalorder %s31_s19, %s392_s27  ;;  %p398_p5 = scmp.lt.s32.totalorder %s392_s27, %s392_s27 }
   0xc   :  { %p399_p6 = por %p398_p5, %p397_p4 }
   0xe   :  { %p400_p7 = pnand %p399_p6, %p393_p3 }
  0x10   :  { %403 = shalt.err (!%p400_p7)
}
  0x11   :  { %s477_s28 = smov 64   ;;  %s478_s29 = smov 4  }
  0x12   :  { %36 = dma.hbm_to_vmem [thread:$0]  %s583_s1, 256, %s31_s19, [#allocation6], %s477_s28, %s477_s28, %s478_s29  }
  0x13   :  { %s479_s7 = smov [#allocation2]   ;;  %s404_s11 = scalar_lea.hbm %s582_s0, 256 }
  0x14   :  { %s18_s8 = sshll.u32 %s479_s7, 4  ;;  %p405_p8 = scmp.ne.s32.totalorder %s582_s0, %s404_s11  ;;  %s19_s8 = int_to_ptr.vmem [resolvable:$true] %s18_s8 }
  0x15   :  { %p408_p9 = scmp.lt.u32.totalorder %s404_s11, %s582_s0 }
  0x17   :  { %p410_p10 = pnand %p408_p9, %p405_p8 }
  0x19   :  { %413 = shalt.err (!%p410_p10)
}
  0x1a   :  { %s414_s16 = scalar_lea.vmem %s19_s8, 256  ;;  %p419_p12 = scmp.lt.s32.totalorder %s19_s8, %s19_s8 }
  0x1b   :  { %p415_p11 = scmp.ne.s32.totalorder %s19_s8, %s414_s16  ;;  %p420_p13 = scmp.lt.s32.totalorder %s414_s16, %s414_s16 }
  0x1d   :  { %p421_p0 = por %p420_p13, %p419_p12 }
  0x1f   :  { %p422_p1 = pnand %p421_p0, %p415_p11 }
  0x21   :  { %425 = shalt.err (!%p422_p1)
}
  0x22   :  { %s480_s1 = smov 128   ;;  %s481_s17 = smov 8  }
  0x23   :  { %24 = dma.hbm_to_vmem [thread:$0]  %s582_s0, 256, %s19_s8, [#allocation3], %s480_s1, %s480_s1, %s481_s17  }
  0x24   :  { %s482_s20 = smov [#allocation7]   ;;  %s426_s24 = scalar_lea.hbm %s585_s3, 1024 }
  0x25   :  { %s44_s21 = sshll.u32 %s482_s20, 4  ;;  %p427_p2 = scmp.ne.s32.totalorder %s585_s3, %s426_s24  ;;  %s45_s21 = int_to_ptr.vmem [resolvable:$true] %s44_s21 }
  0x26   :  { %p430_p3 = scmp.lt.u32.totalorder %s426_s24, %s585_s3 }
  0x28   :  { %p432_p4 = pnand %p430_p3, %p427_p2 }
  0x2a   :  { %435 = shalt.err (!%p432_p4)
}
  0x2b   :  { %s436_s6 = scalar_lea.vmem %s45_s21, 1024  ;;  %p441_p6 = scmp.lt.s32.totalorder %s45_s21, %s45_s21 }
  0x2c   :  { %p437_p5 = scmp.ne.s32.totalorder %s45_s21, %s436_s6  ;;  %p442_p7 = scmp.lt.s32.totalorder %s436_s6, %s436_s6 }
  0x2e   :  { %p443_p8 = por %p442_p7, %p441_p6 }
  0x30   :  { %p444_p9 = pnand %p443_p8, %p437_p5 }
  0x32   :  { %447 = shalt.err (!%p444_p9)
}
  0x33   :  { %50 = dma.hbm_to_vmem [thread:$0]  %s585_s3, 1024, %s45_s21, [#allocation6], %s477_s28, %s477_s28, %s478_s29  }
  0x34   :  { %470 = dma.done.wait [#allocation3], 256  }
  0x35   :  { %471 = vsyncadd [#allocation3], 4294967040 }
  0x36   :  { %472 = dma.done.wait [#allocation6], 1280  }
  0x37   :  { %473 = vsyncadd [#allocation6], 4294966016  ;;  %v483_v0 = vmov 0.0   ;;  %vm484_vm0 = vmmov 0   ;;  %v364_v1 = vld [vmem:[#allocation5] sm:$0xff]   ;;  %v365_v2 = vld [vmem:[#allocation5 + $0x8] sm:$0xff]  }
  0x38   :  { %326 = vmatprep.subr.bf16.mxu0 %v483_v0  ;;  %330 = vmatprep.mubr.msk.bf16.mxu0 %vm484_vm0, %v483_v0  ;;  %v63_v3 = vld [vmem:[#allocation2] sm:$0xff]  ;;  %v64_v4 = vld [vmem:[#allocation2 + $0x8] sm:$0xff]  ;;  %vm89_vm1 = vcmask 261120   ;;  %v368_v8 = vld [vmem:[#allocation7 + $0x10] sm:$0xff]  }
  0x39   :  { %334 = vmatprep.subr.bf16.mxu1 %v483_v0  ;;  %350 = vmatprep.mubr.msk.bf16.mxu1 %vm484_vm0, %v483_v0  ;;  %v366_v5 = vld [vmem:[#allocation7] sm:$0xff]   ;;  %v65_v6 = vpack.c.bf16 %v64_v4, %v63_v3  ;;  %v367_v7 = vld [vmem:[#allocation7 + $0x8] sm:$0xff]   ;;  %v369_v9 = vld [vmem:[#allocation7 + $0x18] sm:$0xff]  }
  0x3a   :  { %327 = vmatpush3.bf16.msra.mxu0 %v364_v1  ;;  %335 = vmatpush3.bf16.msra.mxu1 %v366_v5  ;;  %v370_v10 = vld [vmem:[#allocation7 + $0x20] sm:$0xff]   ;;  %v371_v11 = vld [vmem:[#allocation7 + $0x28] sm:$0xff]   ;;  %v372_v12 = vld [vmem:[#allocation7 + $0x30] sm:$0xff]  }
  0x3b   :  { %328 = vmatprep.subr.bf16.mxu0 %v483_v0  ;;  %336 = vmatprep.subr.bf16.mxu1 %v483_v0  ;;  %v373_v13 = vld [vmem:[#allocation7 + $0x38] sm:$0xff]   ;;  %v301_v14 = vld [vmem:[%s584_s2] ss:$0 sm:$0xff]  ;;  %s485_s2 = smov [#allocation8]  }
  0x3c   :  { %v305_v24 = vld [vmem:[%s586_s4] ss:$0 sm:$0xff]  ;;  %s288_s4 = sshll.u32 %s485_s2, 4  ;;  %s289_s4 = int_to_ptr.vmem [resolvable:$true] %s288_s4 }
  0x3d   :  { %s448_s9 = scalar_lea.vmem %s289_s4, 256  ;;  %p453_p11 = scmp.lt.s32.totalorder %s289_s4, %s289_s4 }
  0x3e   :  { %329 = vmatpush3.bf16.msra.mxu0 %v365_v2  ;;  %337 = vmatpush3.bf16.msra.mxu1 %v367_v7  ;;  %p449_p10 = scmp.ne.s32.totalorder %s289_s4, %s448_s9  ;;  %p454_p12 = scmp.lt.s32.totalorder %s448_s9, %s448_s9 }
  0x3f   :  { %338 = vmatprep.subr.bf16.mxu1 %v483_v0 }
  0x40   :  { %p455_p13 = por %p454_p12, %p453_p11 }
  0x41   :  { %331 = vmatmul.mubr.msk.bf16.vlgmr.msra.gmra.mrb[0].mxu0 %vm89_vm1, %v65_v6 }
  0x42   :  { %339 = vmatpush3.bf16.msra.mxu1 %v368_v8  ;;  %p456_p0 = pnand %p455_p13, %p449_p10 }
  0x43   :  { %340 = vmatprep.subr.bf16.mxu1 %v483_v0 }
  0x46   :  { %341 = vmatpush3.bf16.msra.mxu1 %v369_v9 }
  0x47   :  { %342 = vmatprep.subr.bf16.mxu1 %v483_v0 }
  0x4a   :  { %343 = vmatpush3.bf16.msra.mxu1 %v370_v10 }
  0x4b   :  { %344 = vmatprep.subr.bf16.mxu1 %v483_v0 }
  0x4e   :  { %345 = vmatpush3.bf16.msra.mxu1 %v371_v11 }
  0x4f   :  { %346 = vmatprep.subr.bf16.mxu1 %v483_v0 }
  0x52   :  { %347 = vmatpush3.bf16.msra.mxu1 %v372_v12 }
  0x53   :  { %348 = vmatprep.subr.bf16.mxu1 %v483_v0 }
  0x56   :  { %349 = vmatpush3.bf16.msra.mxu1 %v373_v13 }
 0x114   :  { %v127_v15 = vpop.f32.mrb[0].mxu0 }
 0x115   :  { %v128_v16 = vadd.f32 %v301_v14, %v127_v15  ;;  %v332_v17 = vpop.f32.mrb[1].mxu0 }
 0x116   :  { %v130_v18 = vpop.f32.mrb[2].mxu0 }
 0x117   :  { %v131_v19 = vadd.f32 %v301_v14, %v130_v18  ;;  %v333_v20 = vpop.f32.mrb[3].mxu0  ;;  %v134_v21 = vmax.f32 %v128_v16, 0.0 }
 0x119   :  { %v135_v22 = vmax.f32 %v131_v19, 0.0 }
 0x11b   :  { %v136_v23 = vpack.c.bf16 %v135_v22, %v134_v21 }
 0x11d   :  { %351 = vmatmul.mubr.bf16.vlgmr.msra.gmra.mrb[0].mxu1 %v136_v23 }
 0x1f0   :  { %v242_v25 = vpop.f32.mrb[0].mxu1 }
 0x1f1   :  { %v243_v26 = vadd.f32 %v305_v24, %v242_v25  ;;  %v352_v27 = vpop.f32.mrb[1].mxu1 }
 0x1f2   :  { %v245_v28 = vpop.f32.mrb[2].mxu1 }
 0x1f3   :  { %v251_v29 = vand.u32 2147483647, %v243_v26  ;;  %v246_v30 = vadd.f32 %v305_v24, %v245_v28  ;;  %v353_v31 = vpop.f32.mrb[3].mxu1  ;;  %v249_v51 = vmax.f32 %v243_v26, 0.0 }
 0x1f5   :  { %v253_v32 = vsub.f32 0.0, %v251_v29  ;;  %v252_v33 = vand.u32 2147483647, %v246_v30  ;;  %v250_v56 = vmax.f32 %v246_v30, 0.0 }
 0x1f7   :  { %v255_v34 = vmul.f32 1.442695, %v253_v32  ;;  %v254_v35 = vsub.f32 0.0, %v252_v33 }
 0x1f9   :  { %374 = vpow2.f32 %v255_v34  ;;  %v257_v36 = vmul.f32 1.442695, %v254_v35 }
 0x1fb   :  { %376 = vpow2.f32 %v257_v36 }
 0x203   :  { %v375_v37 = vpop.eup %374 }
 0x204   :  { %v259_v38 = vadd.f32 1.0, %v375_v37  ;;  %v262_v41 = vmul.f32 -0.5, %v375_v37  ;;  %v265_v44 = vand.u32 2147483647, %v375_v37 }
 0x205   :  { %v377_v39 = vpop.eup %376 }
 0x206   :  { %378 = vlog2.f32 %v259_v38  ;;  %v268_v40 = vadd.f32 1.0, %v377_v39  ;;  %v271_v42 = vmul.f32 -0.5, %v377_v39  ;;  %v263_v43 = vadd.f32 1.0, %v262_v41 }
 0x207   :  { %v274_v47 = vand.u32 2147483647, %v377_v39  ;;  %vm266_vm2 = vcmp.lt.f32.partialorder %v265_v44, 0.0004427343 }
 0x208   :  { %380 = vlog2.f32 %v268_v40  ;;  %v272_v45 = vadd.f32 1.0, %v271_v42  ;;  %v264_v49 = vmul.f32 %v375_v37, %v263_v43 }
 0x209   :  { %vm275_vm3 = vcmp.lt.f32.partialorder %v274_v47, 0.0004427343 }
 0x20a   :  { %v273_v54 = vmul.f32 %v377_v39, %v272_v45 }
 0x210   :  { %v379_v46 = vpop.eup %378 }
 0x211   :  { %v261_v48 = vmul.f32 0.6931472, %v379_v46 }
 0x212   :  { %v381_v50 = vpop.eup %380 }
 0x213   :  { %v267_v52 = vsel %vm266_vm2, %v264_v49, %v261_v48  ;;  %v270_v53 = vmul.f32 0.6931472, %v381_v50 }
 0x214   :  { %v277_v55 = vadd.f32 %v267_v52, %v249_v51 }
 0x215   :  { %v276_v57 = vsel %vm275_vm3, %v273_v54, %v270_v53 }
 0x216   :  { %v279_v58 = vadd.f32 1e-08, %v277_v55  ;;  %v278_v59 = vadd.f32 %v276_v57, %v250_v56 }
 0x218   :  { %281 = vst [vmem:[#allocation8] sm:$0xff] %v279_v58  ;;  %v280_v60 = vadd.f32 1e-08, %v278_v59 }
 0x21a   :  { %282 = vst [vmem:[#allocation8 + $0x8] sm:$0xff] %v280_v60 }
 0x21b   :  { %459 = shalt.err (!%p456_p0)
}
 0x21c   :  { %s460_s12 = scalar_lea.hbm %s587_s5, 256 }
 0x21d   :  { %p461_p1 = scmp.ne.s32.totalorder %s587_s5, %s460_s12  ;;  %p464_p2 = scmp.lt.u32.totalorder %s460_s12, %s587_s5 }
 0x21f   :  { %p466_p3 = pnand %p464_p2, %p461_p1 }
 0x221   :  { %469 = shalt.err (!%p466_p3)
}
 0x222   :  { %294 = dma.vmem_to_hbm [thread:$0]  %s289_s4, 256, %s587_s5, [#allocation4], %s480_s1, %s480_s1, %s481_s17  }
 0x223   :  { %474 = dma.done.wait [#allocation4], 256  }
 0x224   :  { %475 = vsyncadd [#allocation4], 4294967040 }
 0x225   :  { %298 = vsyncpa [#allocation3], 1 }
 0x226   :  { %299 = vsyncpa [#allocation6], 1 }
 0x227   :  { %300 = vsyncpa [#allocation4], 1 }

</bundles_post_ra>
